<compile_context>
chip_gen: v7x
topology: tpu7x:2x2x1
jax: 0.10.0
libtpu: 0.0.40
codegen_flags: <defaults>
</compile_context>

<pallas_src>
import functools

import numpy as np
import jax
import jax.numpy as jnp
from jax import lax
from jax.experimental import pallas as pl
from jax.experimental.pallas import tpu as pltpu


def _side_output_kernel(xi_ref, w0_ref, b0_ref, dt_ref, bt_ref, o_ref, y1s_ref,
                        *, NB, H, HQ, nwin, win0, top, rows_scr, kt_pad):
    """Fused conv0 (3x3 pad 1) + ConvTranspose2d (2s, s, p) for NB images.

    xi_ref : (NB, H, K0p)        row-im2col input, lanes = (ky, ci, x), K zero-padded
    w0_ref : (K0p, CW)           banded conv0 weight, CW = Cout*W
    b0_ref : (1, CW)
    dt_ref : (KT, s*CWo)         block-banded fused transconv weight, CWo = Cout*Wout
    bt_ref : (1, s*CWo)
    o_ref  : (NB, HQ, s*CWo)     phase-blocked output rows (lane-dense store)
    y1s_ref: (NB, rows_scr, CW)  VMEM scratch: y1 rows + zero halo rows
    """
    CW = w0_ref.shape[-1]
    K0p = xi_ref.shape[-1]

    # ---- stage 1: Conv2d 3x3 s1 p1 -> one deep matmul over all NB images ----
    lhs0 = xi_ref[...].reshape(NB * H, K0p)
    y1 = jnp.dot(lhs0, w0_ref[...], preferred_element_type=jnp.float32)
    y1 = y1 + b0_ref[...]                                   # bias added once

    bt = bt_ref[...]                                        # hoisted, added once/image
    for b in range(NB):
        # ---- stage y1 (+ zero row halo) in VMEM scratch ----------------------
        if top > 0:
            y1s_ref[b, 0:top, :] = jnp.zeros((top, CW), jnp.float32)
        y1s_ref[b, top:top + H, :] = y1[b * H:(b + 1) * H, :]
        if rows_scr > top + H:
            y1s_ref[b, top + H:rows_scr, :] = jnp.zeros(
                (rows_scr - top - H, CW), jnp.float32)

        # ---- stage 2: transposed conv = ONE matmul over (row-tap, phase) -----
        wins = [y1s_ref[b, win0 + w:win0 + w + HQ, :] for w in range(nwin)]
        if kt_pad > 0:
            wins.append(jnp.zeros((HQ, kt_pad), jnp.float32))
        lhs1 = jnp.concatenate(wins, axis=-1)               # (HQ, KT)
        r = jnp.dot(lhs1, dt_ref[...], preferred_element_type=jnp.float32) + bt
        o_ref[b, :, :] = r.astype(o_ref.dtype)


def _prep_conv0_weights(w0, b0, W, k0_pad_to):
    """Banded conv0 weight with all (ky, ci, kx) taps folded into the contraction."""
    Cout, Cin, KH, KW = w0.shape
    Wp = W + 2
    # e[kx, xc, ox] = 1  iff  xc == ox + kx
    e = np.stack([np.eye(Wp, W, k=-kx, dtype=np.float32) for kx in range(KW)])
    w0mix = jnp.einsum("ocyk,kxr->ycxor", w0.astype(jnp.float32), e)
    w0mix = w0mix.reshape(KH * Cin * Wp, Cout * W)        # rows: ky*Cin*Wp + ci*Wp + xc
    w0mix = jnp.pad(w0mix, ((0, k0_pad_to - KH * Cin * Wp), (0, 0)))
    b0row = jnp.repeat(b0.astype(jnp.float32), W)[None, :]
    return w0mix, b0row


def _prep_transconv_weights(wt, bt, W, s, p, base, nwin, kt_pad_to):
    """Block-banded weight folding both row-taps and all s phases into one matmul.

    Row-block widx holds the contribution of y1 rows (base+widx+j); column block oy0
    produces output rows oy = j*s + oy0.
    """
    Cin2, Cout, K2, _ = wt.shape
    assert K2 == 2 * s, "side_output uses kernel_size == 2*factor"
    Wout = (W - 1) * s - 2 * p + K2
    ox = np.arange(Wout)
    n = (ox + p) // s
    px = (ox + p) % s
    CW = Cin2 * W
    CWo = Cout * Wout
    D = jnp.zeros((nwin * CW, s * CWo), jnp.float32)
    for oy0 in range(s):
        m0 = (oy0 + p) // s
        py = (oy0 + p) % s
        for a in range(2):                                   # row tap: y1 row m0+j-a
            widx = m0 - a - base                             # which row-window feeds it
            wk = wt[:, :, py + a * s, :].astype(jnp.float32)   # (Cin2, Cout, K2)
            acc = 0.0
            for b in range(2):                               # width tap: y1 col n-b
                # ind[w, ox] = 1 iff y1 column w feeds output column ox via tap b
                ind = (np.arange(W)[:, None] == (n - b)[None, :]).astype(np.float32)
                wsel = jnp.take(wk, jnp.asarray(px + b * s, jnp.int32), axis=2)
                acc = acc + jnp.einsum("wx,iox->iwox", ind, wsel)
            blk = acc.reshape(CW, CWo)
            D = D.at[widx * CW:(widx + 1) * CW, oy0 * CWo:(oy0 + 1) * CWo].add(blk)
    D = jnp.pad(D, ((0, kt_pad_to - nwin * CW), (0, 0)))
    btrow = jnp.tile(jnp.repeat(bt.astype(jnp.float32), Wout), s)[None, :]
    return D, btrow, Wout


def side_output_forward(x_nchw, params, *, factor, padding, images_per_step=1):
    """Pallas forward pass of side_output (NCHW in, NCHW out)."""
    w0, b0, wt, bt = params["w0"], params["b0"], params["wt"], params["bt"]
    N, Cin, H, W = x_nchw.shape
    Cout = w0.shape[0]
    s, p = factor, padding
    K2 = 2 * s
    Hout = (H - 1) * s - 2 * p + K2
    NB = images_per_step
    assert N % NB == 0, "images_per_step must divide the batch"

    Wp = W + 2
    CW = Cout * W

    # ---- static row-window parameters for the phase-decomposed transconv ---
    HQ = -(-Hout // s)                                   # ceil(Hout / s)
    m0s = [(oy0 + p) // s for oy0 in range(s)]
    base = min(m0s) - 1                                  # lowest y1 row referenced
    nwin = max(m0s) - base + 1                           # adjacent row windows (<= 3)
    lo = min(base, 0)
    top = -lo                                            # zero halo rows above y1
    win0 = base - lo                                     # scratch row of window 0
    rows_scr = max(win0 + nwin - 1 + HQ, top + H)

    # ---- lane/contraction padding to multiples of 128 ----------------------
    K0 = 3 * Cin * Wp
    K0p = -(-K0 // 128) * 128                            # 216 -> 256 here
    KT = -(-(nwin * CW) // 128) * 128                    # 192 -> 256 here
    kt_pad = KT - nwin * CW

    # ---- one-time weight / bias preprocessing (wrapper side) ---------------
    w0mix, b0row = _prep_conv0_weights(w0, b0, W, K0p)
    dmix, btrow, Wout = _prep_transconv_weights(wt, bt, W, s, p, base, nwin, KT)
    CWo = Cout * Wout

    # ---- row-im2col input: lanes = (ky, ci, x), zero-padded to K0p ----------
    xpad = jnp.pad(x_nchw.astype(jnp.float32), ((0, 0), (0, 0), (1, 1), (1, 1)))
    xrow = jnp.transpose(xpad, (0, 2, 1, 3)).reshape(N, H + 2, Cin * Wp)
    xi = jnp.concatenate([xrow[:, ky:ky + H, :] for ky in range(3)], axis=-1)
    xi = jnp.pad(xi, ((0, 0), (0, 0), (0, K0p - K0)))

    kernel = functools.partial(_side_output_kernel, NB=NB, H=H, HQ=HQ, nwin=nwin,
                               win0=win0, top=top, rows_scr=rows_scr, kt_pad=kt_pad)

    out = pl.pallas_call(
        kernel,
        out_shape=jax.ShapeDtypeStruct((N, HQ, s * CWo), jnp.float32),
        grid=(N // NB,),
        in_specs=[
            pl.BlockSpec((NB, H, K0p), lambda nb: (nb, 0, 0)),
            pl.BlockSpec((K0p, CW), lambda nb: (0, 0)),
            pl.BlockSpec((1, CW), lambda nb: (0, 0)),
            pl.BlockSpec((KT, s * CWo), lambda nb: (0, 0)),
            pl.BlockSpec((1, s * CWo), lambda nb: (0, 0)),
        ],
        out_specs=pl.BlockSpec((NB, HQ, s * CWo), lambda nb: (nb, 0, 0)),
        scratch_shapes=[pltpu.VMEM((NB, rows_scr, CW), jnp.float32)],
        compiler_params=pltpu.CompilerParams(
            dimension_semantics=("parallel",),
            vmem_limit_bytes=32 * 1024 * 1024),
    )(xi, w0mix, b0row, dmix, btrow)

    # un-interleave the s output-row phases -> NCHW, crop to Hout
    out = out.reshape(N, HQ, s, Cout, Wout)
    out = jnp.transpose(out, (0, 3, 1, 2, 4)).reshape(N, Cout, HQ * s, Wout)
    return out[:, :, :Hout, :]


def side_output_reference(x_nchw, params, *, factor, padding):
    """Pure-JAX (XLA conv) reference with identical semantics."""
    w0, b0, wt, bt = params["w0"], params["b0"], params["wt"], params["bt"]
    x = jnp.transpose(x_nchw, (0, 2, 3, 1)).astype(jnp.float32)
    w0_hwio = jnp.transpose(w0, (2, 3, 1, 0))
    y1 = lax.conv_general_dilated(
        x, w0_hwio, (1, 1), [(1, 1), (1, 1)],
        dimension_numbers=("NHWC", "HWIO", "NHWC")) + b0
    K2 = 2 * factor
    q = K2 - 1 - padding
    wt_hwio = jnp.transpose(wt[:, :, ::-1, ::-1], (2, 3, 0, 1))
    y2 = lax.conv_general_dilated(
        y1, wt_hwio, (1, 1), [(q, q), (q, q)],
        lhs_dilation=(factor, factor),
        dimension_numbers=("NHWC", "HWIO", "NHWC")) + bt
    return jnp.transpose(y2, (0, 3, 1, 2))


if __name__ == "__main__":
    N, inChans, outChans, H, W = 2, 4, 4, 16, 16
    factor, padding = 2, 1
    K2 = 2 * factor

    key = jax.random.PRNGKey(0)
    k1, k2, k3, k4, k5 = jax.random.split(key, 5)
    x = jax.random.normal(k1, (N, inChans, H, W), jnp.float32)
    params = {
        # conv0: Conv2d(inChans, outChans, 3, 1, 1)
        "w0": 0.1 * jax.random.normal(k2, (outChans, inChans, 3, 3), jnp.float32),
        "b0": 0.1 * jax.random.normal(k3, (outChans,), jnp.float32),
        # transconv1: ConvTranspose2d(outChans, outChans, 2*factor, factor, padding)
        "wt": 0.1 * jax.random.normal(k4, (outChans, outChans, K2, K2), jnp.float32),
        "bt": 0.1 * jax.random.normal(k5, (outChans,), jnp.float32),
    }

    fwd = jax.jit(functools.partial(side_output_forward,
                                    factor=factor, padding=padding))
    out = jax.block_until_ready(fwd(x, params))

    Hout = (H - 1) * factor - 2 * padding + K2
    assert out.shape == (N, outChans, Hout, Hout), out.shape

    ref = side_output_reference(x, params, factor=factor, padding=padding)
    max_err = float(jnp.max(jnp.abs(out - ref)))
    assert max_err < 1e-4, max_err

    print("KERNEL_OK")
</pallas_src>

<mosaic_0001>
module attributes {stable_mosaic.version = 11 : i64} {
  func.func @_side_output_kernel(%arg0: i32, %arg1: memref<1x16x256xf32, #tpu.memory_space<vmem>>, %arg2: memref<256x64xf32, #tpu.memory_space<vmem>>, %arg3: memref<1x64xf32, #tpu.memory_space<vmem>>, %arg4: memref<256x256xf32, #tpu.memory_space<vmem>>, %arg5: memref<1x256xf32, #tpu.memory_space<vmem>>, %arg6: memref<1x16x256xf32, #tpu.memory_space<vmem>>, %arg7: memref<1x18x64xf32, #tpu.memory_space<vmem>>) attributes {dimension_semantics = [#tpu.dimension_semantics<parallel>], iteration_bounds = array<i64: 2>, scalar_prefetch = 0 : i64, scratch_operands = 1 : i64, tpu.core_type = #tpu.core_type<tc>, window_params = [{transform_indices = @transform_0, window_bounds = array<i64: 1, 16, 256>}, {pipeline_mode = #tpu.pipeline_mode<synchronous>, transform_indices = @transform_1, window_bounds = array<i64: 256, 64>}, {pipeline_mode = #tpu.pipeline_mode<synchronous>, transform_indices = @transform_2, window_bounds = array<i64: 1, 64>}, {pipeline_mode = #tpu.pipeline_mode<synchronous>, transform_indices = @transform_3, window_bounds = array<i64: 256, 256>}, {pipeline_mode = #tpu.pipeline_mode<synchronous>, transform_indices = @transform_4, window_bounds = array<i64: 1, 256>}, {transform_indices = @transform_5, window_bounds = array<i64: 1, 16, 256>}]} {
    %c0 = arith.constant 0 : index
    %c0_0 = arith.constant 0 : index
    %c0_1 = arith.constant 0 : index
    %0 = vector.load %arg1[%c0, %c0_0, %c0_1] : memref<1x16x256xf32, #tpu.memory_space<vmem>>, vector<1x16x256xf32>
    %1 = vector.shape_cast %0 : vector<1x16x256xf32> to vector<16x256xf32>
    %c0_2 = arith.constant 0 : index
    %c0_3 = arith.constant 0 : index
    %2 = vector.load %arg2[%c0_2, %c0_3] : memref<256x64xf32, #tpu.memory_space<vmem>>, vector<256x64xf32>
    %cst = arith.constant dense<0.000000e+00> : vector<16x64xf32>
    %3 = tpu.matmul %1, %2, %cst {dimension_numbers = #tpu.dot_dimension_numbers<[1], [0], [0], [1], [0, 0, 1, 1], [], []>} : vector<16x256xf32>, vector<256x64xf32>, vector<16x64xf32> -> vector<16x64xf32>
    %c0_4 = arith.constant 0 : index
    %c0_5 = arith.constant 0 : index
    %4 = vector.load %arg3[%c0_4, %c0_5] : memref<1x64xf32, #tpu.memory_space<vmem>>, vector<1x64xf32>
    %5 = vector.broadcast %4 : vector<1x64xf32> to vector<16x64xf32>
    %6 = arith.addf %3, %5 : vector<16x64xf32>
    %c0_6 = arith.constant 0 : index
    %c0_7 = arith.constant 0 : index
    %7 = vector.load %arg5[%c0_6, %c0_7] : memref<1x256xf32, #tpu.memory_space<vmem>>, vector<1x256xf32>
    %cst_8 = arith.constant 0.000000e+00 : f32
    %8 = vector.broadcast %cst_8 : f32 to vector<1x64xf32>
    %c0_9 = arith.constant 0 : index
    %c0_10 = arith.constant 0 : index
    %c0_11 = arith.constant 0 : index
    %9 = vector.load %arg7[%c0_9, %c0_10, %c0_11] : memref<1x18x64xf32, #tpu.memory_space<vmem>>, vector<1x1x64xf32>
    %10 = vector.shape_cast %9 : vector<1x1x64xf32> to vector<1x64xf32>
    %11 = vector.shape_cast %8 : vector<1x64xf32> to vector<1x1x64xf32>
    tpu.vector_store %arg7[%c0_9, %c0_10, %c0_11], %11 {strides = array<i32>} : memref<1x18x64xf32, #tpu.memory_space<vmem>>, vector<1x1x64xf32>,
    %c0_12 = arith.constant 0 : index
    %c1 = arith.constant 1 : index
    %c0_13 = arith.constant 0 : index
    %12 = vector.load %arg7[%c0_12, %c1, %c0_13] : memref<1x18x64xf32, #tpu.memory_space<vmem>>, vector<1x16x64xf32>
    %13 = vector.shape_cast %12 : vector<1x16x64xf32> to vector<16x64xf32>
    %14 = vector.shape_cast %6 : vector<16x64xf32> to vector<1x16x64xf32>
    tpu.vector_store %arg7[%c0_12, %c1, %c0_13], %14 {strides = array<i32>} : memref<1x18x64xf32, #tpu.memory_space<vmem>>, vector<1x16x64xf32>,
    %cst_14 = arith.constant 0.000000e+00 : f32
    %15 = vector.broadcast %cst_14 : f32 to vector<1x64xf32>
    %c0_15 = arith.constant 0 : index
    %c17 = arith.constant 17 : index
    %c0_16 = arith.constant 0 : index
    %16 = vector.load %arg7[%c0_15, %c17, %c0_16] : memref<1x18x64xf32, #tpu.memory_space<vmem>>, vector<1x1x64xf32>
    %17 = vector.shape_cast %16 : vector<1x1x64xf32> to vector<1x64xf32>
    %18 = vector.shape_cast %15 : vector<1x64xf32> to vector<1x1x64xf32>
    tpu.vector_store %arg7[%c0_15, %c17, %c0_16], %18 {strides = array<i32>} : memref<1x18x64xf32, #tpu.memory_space<vmem>>, vector<1x1x64xf32>,
    %c0_17 = arith.constant 0 : index
    %c0_18 = arith.constant 0 : index
    %c0_19 = arith.constant 0 : index
    %19 = vector.load %arg7[%c0_17, %c0_18, %c0_19] : memref<1x18x64xf32, #tpu.memory_space<vmem>>, vector<1x16x64xf32>
    %20 = vector.shape_cast %19 : vector<1x16x64xf32> to vector<16x64xf32>
    %c0_20 = arith.constant 0 : index
    %c1_21 = arith.constant 1 : index
    %c0_22 = arith.constant 0 : index
    %21 = vector.load %arg7[%c0_20, %c1_21, %c0_22] : memref<1x18x64xf32, #tpu.memory_space<vmem>>, vector<1x16x64xf32>
    %22 = vector.shape_cast %21 : vector<1x16x64xf32> to vector<16x64xf32>
    %c0_23 = arith.constant 0 : index
    %c2 = arith.constant 2 : index
    %c0_24 = arith.constant 0 : index
    %23 = vector.load %arg7[%c0_23, %c2, %c0_24] : memref<1x18x64xf32, #tpu.memory_space<vmem>>, vector<1x16x64xf32>
    %24 = vector.shape_cast %23 : vector<1x16x64xf32> to vector<16x64xf32>
    %cst_25 = arith.constant 0.000000e+00 : f32
    %25 = vector.broadcast %cst_25 : f32 to vector<16x64xf32>
    %26 = tpu.concatenate %20, %22, %24, %25 in 1 : vector<16x64xf32>, vector<16x64xf32>, vector<16x64xf32>, vector<16x64xf32> -> vector<16x256xf32>
    %c0_26 = arith.constant 0 : index
    %c0_27 = arith.constant 0 : index
    %27 = vector.load %arg4[%c0_26, %c0_27] : memref<256x256xf32, #tpu.memory_space<vmem>>, vector<256x256xf32>
    %cst_28 = arith.constant dense<0.000000e+00> : vector<16x256xf32>
    %28 = tpu.matmul %26, %27, %cst_28 {dimension_numbers = #tpu.dot_dimension_numbers<[1], [0], [0], [1], [0, 0, 1, 1], [], []>} : vector<16x256xf32>, vector<256x256xf32>, vector<16x256xf32> -> vector<16x256xf32>
    %29 = vector.broadcast %7 : vector<1x256xf32> to vector<16x256xf32>
    %30 = arith.addf %28, %29 : vector<16x256xf32>
    %c0_29 = arith.constant 0 : index
    %c0_30 = arith.constant 0 : index
    %c0_31 = arith.constant 0 : index
    %31 = vector.load %arg6[%c0_29, %c0_30, %c0_31] : memref<1x16x256xf32, #tpu.memory_space<vmem>>, vector<1x16x256xf32>
    %32 = vector.shape_cast %31 : vector<1x16x256xf32> to vector<16x256xf32>
    %33 = vector.shape_cast %30 : vector<16x256xf32> to vector<1x16x256xf32>
    tpu.vector_store %arg6[%c0_29, %c0_30, %c0_31], %33 {strides = array<i32>} : memref<1x16x256xf32, #tpu.memory_space<vmem>>, vector<1x16x256xf32>,
    return
  }
  func.func @transform_0(%arg0: i32) -> (i32, i32, i32) {
    %c0_i32 = arith.constant 0 : i32
    %c0_i32_0 = arith.constant 0 : i32
    %c0_i32_1 = arith.constant 0 : i32
    return %arg0, %c0_i32, %c0_i32_0 : i32, i32, i32
  }
  func.func @transform_1(%arg0: i32) -> (i32, i32) {
    %c0_i32 = arith.constant 0 : i32
    %c0_i32_0 = arith.constant 0 : i32
    %c0_i32_1 = arith.constant 0 : i32
    return %c0_i32, %c0_i32_0 : i32, i32
  }
  func.func @transform_2(%arg0: i32) -> (i32, i32) {
    %c0_i32 = arith.constant 0 : i32
    %c0_i32_0 = arith.constant 0 : i32
    %c0_i32_1 = arith.constant 0 : i32
    return %c0_i32, %c0_i32_0 : i32, i32
  }
  func.func @transform_3(%arg0: i32) -> (i32, i32) {
    %c0_i32 = arith.constant 0 : i32
    %c0_i32_0 = arith.constant 0 : i32
    %c0_i32_1 = arith.constant 0 : i32
    return %c0_i32, %c0_i32_0 : i32, i32
  }
  func.func @transform_4(%arg0: i32) -> (i32, i32) {
    %c0_i32 = arith.constant 0 : i32
    %c0_i32_0 = arith.constant 0 : i32
    %c0_i32_1 = arith.constant 0 : i32
    return %c0_i32, %c0_i32_0 : i32, i32
  }
  func.func @transform_5(%arg0: i32) -> (i32, i32, i32) {
    %c0_i32 = arith.constant 0 : i32
    %c0_i32_0 = arith.constant 0 : i32
    %c0_i32_1 = arith.constant 0 : i32
    return %arg0, %c0_i32, %c0_i32_0 : i32, i32, i32
  }
}

</mosaic_0001>

<bundles_post_ra>
// kernel: tile.5
= control target key start
LH: loop header
LB: loop body
LE: loop exit
PB: predicated region body
PF: predicated region fallthrough
CT: control target
= control target key end

     0   :  { %vm7_vm0 = vcmask 261120   ;;  %s37_s8 = smov 32   ;;  %s38_s9 = smov 64   ;;  %vm13_vm1 = vcmask 1048320   ;;  %vm19_vm2 = vcmask 785920   ;;  %vm25_vm3 = vcmask 523520   ;;  %s55_s0 = inlined_call_operand.vmem [shape: f32[4,32], index: 0, kind: input, shape index: {}]   ;;  %s56_s1 = inlined_call_operand.vmem [shape: f32[128], index: 1, kind: output, shape index: {}]  }
   0x1   :  { %v4_v0 = vld [vmem:[%s55_s0] sm:$0xf]  ;;  %s36_s0 = smov 96  }
   0x2   :  { %5 = vst [vmem:[#allocation1] sm:$0xf] %v4_v0 }
   0x9   :  { %v10_v1 = vld [vmem:[#allocation1 + $0x3] sm:$0x1]   ;;  %v22_v2 = vld [vmem:[#allocation1 + $0x1] sm:$0x1]   ;;  %v6_v3 = vld [vmem:[#allocation1] sm:$0x1]  }
   0xa   :  { %11 = vrot.lane.b32.xlu0 %v10_v1, %s36_s0  ;;  %23 = vrot.lane.b32.xlu1 %v22_v2, %s37_s8  ;;  %v16_v4 = vld [vmem:[#allocation1 + $0x2] sm:$0x1]   ;;  %8 = vst.msk [vmem:[#allocation0] sm:$0x1] %vm7_vm0, %v6_v3  }
   0xe   :  { %17 = vrot.lane.b32.xlu0 %v16_v4, %s38_s9 }
  0x7c   :  { %v12_v5 = vpop.permute.xlu0 %11   ;;  %v24_v6 = vpop.permute.xlu1 %23  }
  0x7d   :  { %14 = vst.msk [vmem:[#allocation0] sm:$0x1] %vm13_vm1, %v12_v5  }
  0x80   :  { %v18_v7 = vpop.permute.xlu0 %17  }
  0x81   :  { %20 = vst.msk [vmem:[#allocation0] sm:$0x1] %vm19_vm2, %v18_v7  }
  0x82   :  { %26 = vst.msk [vmem:[#allocation0] sm:$0x1] %vm25_vm3, %v24_v6  }
  0x89   :  { %v30_v8 = vld [vmem:[#allocation0] sm:$0x1] }
  0x8a   :  { %32 = vst [vmem:[%s56_s1] sm:$0x1] %v30_v8 }

// kernel: tile.6
= control target key start
LH: loop header
LB: loop body
LE: loop exit
PB: predicated region body
PF: predicated region fallthrough
CT: control target
= control target key end

     0   :  { %s22_s0 = inlined_call_operand.vmem [shape: f32[128], index: 0, kind: input, shape index: {}]   ;;  %s23_s1 = inlined_call_operand.vmem [shape: f32[2,128], index: 1, kind: output, shape index: {}]  }
   0x1   :  { %v4_v0 = vld [vmem:[%s22_s0] ss:$0 sm:$0xff] }
   0x2   :  { %5 = vst [vmem:[%s23_s1] sm:$0x3] %v4_v0 }

// kernel: side_output_forward.1
= control target key start
LH: loop header
LB: loop body
LE: loop exit
PB: predicated region body
PF: predicated region fallthrough
CT: control target
= control target key end

     0   :  { %s779_s18 = smov 0   ;;  %s1109_s0 = inlined_call_operand.vmem [shape: f32[2,16,256], index: 0, kind: input, shape index: {}]   ;;  %s1110_s1 = inlined_call_operand.vmem [shape: f32[256,64], index: 1, kind: input, shape index: {}]   ;;  %s1111_s2 = inlined_call_operand.vmem [shape: f32[1,64], index: 2, kind: input, shape index: {}]   ;;  %s1112_s3 = inlined_call_operand.vmem [shape: f32[256,256], index: 3, kind: input, shape index: {}]   ;;  %s1113_s4 = inlined_call_operand.vmem [shape: f32[1,256], index: 4, kind: input, shape index: {}]   ;;  %s1114_s5 = inlined_call_operand.vmem [shape: f32[2,16,256], index: 5, kind: output, shape index: {}]  }
   0x1 LB: > { %s579_s19 = sadd.s32 4294967295, %s745_s18   ;;  %p583_p0 = scmp.ge.s32.totalorder %s745_s18, 1  ;;  %s745_s18 = sphi %s779_s18, %s15_s18  }
   0x2   : > { %p187_p1 = scmp.lt.s32.totalorder %s745_s18, 3 }
   0x4   : > { %p188_p2 = pnand %p583_p0, %p187_p1 }
   0x5   : > { %v245_v0 = vld [vmem:[%s1110_s1 + $0x80] sm:$0xff] (!%p188_p2)  ;;  %v246_v1 = vld [vmem:[%s1110_s1 + $0x88] sm:$0xff] (!%p188_p2)  ;;  %p215_p3 = scmp.lt.s32.totalorder (!%p188_p2), %s579_s19, 1  ;;  %v247_v5 = vld [vmem:[%s1110_s1 + $0x90] sm:$0xff] (!%p188_p2)  ;;  %vm344_vm0 = vcmask (!%p188_p2), 516096   ;;  %v747_v52 = vmov (!%p188_p2), 0.0  }
   0x6   : > { %191 = sbr.rel (%p188_p2) target bundleno = 602 (0x25a), region = 40  ;;  %v229_v2 = vld [vmem:[%s1110_s1] sm:$0xff] (!%p188_p2)  ;;  %v633_v3 = vpack.c.bf16 (!%p188_p2), %v246_v1, %v245_v0  ;;  %v230_v4 = vld [vmem:[%s1110_s1 + $0x8] sm:$0xff] (!%p188_p2)  ;;  %v248_v6 = vld [vmem:[%s1110_s1 + $0x98] sm:$0xff] (!%p188_p2)  ;;  %345 = vst.msk [vmem:[#allocation2] sm:$0x1] (!%p188_p2), %vm344_vm0, %v747_v52 }
   0x7   : > { %v635_v7 = vpack.c.bf16 (!%p188_p2), %v230_v4, %v229_v2  ;;  %v637_v8 = vpack.c.bf16 (!%p188_p2), %v248_v6, %v247_v5  ;;  %v231_v9 = vld [vmem:[%s1110_s1 + $0x10] sm:$0xff] (!%p188_p2)  ;;  %v232_v10 = vld [vmem:[%s1110_s1 + $0x18] sm:$0xff] (!%p188_p2)  ;;  %v249_v11 = vld [vmem:[%s1110_s1 + $0xa0] sm:$0xff] (!%p188_p2)  ;;  %349 = vst.msk [vmem:[#allocation2 + $0x11] sm:$0x1] (!%p188_p2), %vm344_vm0, %v747_v52  ;;  %vm346_vm1 = vcmask (!%p188_p2), 523264  }
   0x8   : > { %634 = vmatprep.subr.bf16.mxu0 (!%p188_p2), %v633_v3  ;;  %v250_v12 = vld [vmem:[%s1110_s1 + $0xa8] sm:$0xff] (!%p188_p2)  ;;  %v639_v13 = vpack.c.bf16 (!%p188_p2), %v232_v10, %v231_v9  ;;  %v233_v15 = vld [vmem:[%s1110_s1 + $0x20] sm:$0xff] (!%p188_p2)  ;;  %v251_v17 = vld [vmem:[%s1110_s1 + $0xb0] sm:$0xff] (!%p188_p2)  ;;  %s748_s20 = smov (!%p188_p2), 64  }
   0x9   : > { %636 = vmatpush3.bf16.msra.mxu0 (!%p188_p2), %v635_v7  ;;  %v641_v14 = vpack.c.bf16 (!%p188_p2), %v250_v12, %v249_v11  ;;  %v234_v16 = vld [vmem:[%s1110_s1 + $0x28] sm:$0xff] (!%p188_p2)  ;;  %v252_v18 = vld [vmem:[%s1110_s1 + $0xb8] sm:$0xff] (!%p188_p2)  ;;  %v235_v21 = vld [vmem:[%s1110_s1 + $0x30] sm:$0xff] (!%p188_p2) }
   0xa   : > { %638 = vmatprep.subr.bf16.mxu0 (!%p188_p2), %v637_v8  ;;  %v643_v19 = vpack.c.bf16 (!%p188_p2), %v234_v16, %v233_v15  ;;  %v645_v20 = vpack.c.bf16 (!%p188_p2), %v252_v18, %v251_v17  ;;  %v236_v22 = vld [vmem:[%s1110_s1 + $0x38] sm:$0xff] (!%p188_p2)  ;;  %v253_v23 = vld [vmem:[%s1110_s1 + $0xc0] sm:$0xff] (!%p188_p2)  ;;  %v254_v24 = vld [vmem:[%s1110_s1 + $0xc8] sm:$0xff] (!%p188_p2) }
   0xb   : > { %v647_v26 = vpack.c.bf16 (!%p188_p2), %v236_v22, %v235_v21  ;;  %v649_v27 = vpack.c.bf16 (!%p188_p2), %v254_v24, %v253_v23  ;;  %v237_v28 = vld [vmem:[%s1110_s1 + $0x40] sm:$0xff] (!%p188_p2)  ;;  %v238_v29 = vld [vmem:[%s1110_s1 + $0x48] sm:$0xff] (!%p188_p2)  ;;  %v255_v30 = vld [vmem:[%s1110_s1 + $0xd0] sm:$0xff] (!%p188_p2) }
   0xc   : > { %v256_v31 = vld [vmem:[%s1110_s1 + $0xd8] sm:$0xff] (!%p188_p2)  ;;  %v651_v32 = vpack.c.bf16 (!%p188_p2), %v238_v29, %v237_v28  ;;  %v239_v34 = vld [vmem:[%s1110_s1 + $0x50] sm:$0xff] (!%p188_p2)  ;;  %v257_v36 = vld [vmem:[%s1110_s1 + $0xe0] sm:$0xff] (!%p188_p2) }
   0xd   : > { %s1116_s19 = smov (!%p215_p3, %s579_s19), 1  ;;  %640 = vmatpush3.bf16.msra.mxu0 %v639_v13  ;;  %v653_v33 = vpack.c.bf16 %v256_v31, %v255_v30  ;;  %v240_v35 = vld [vmem:[%s1110_s1 + $0x58] sm:$0xff]  ;;  %v258_v37 = vld [vmem:[%s1110_s1 + $0xe8] sm:$0xff]  ;;  %v241_v40 = vld [vmem:[%s1110_s1 + $0x60] sm:$0xff] }
   0xe   : > { %s593_s15 = sshll.u32 %s1116_s19, 5  ;;  %642 = vmatprep.subr.bf16.mxu0 %v641_v14  ;;  %v655_v38 = vpack.c.bf16 %v240_v35, %v239_v34  ;;  %v657_v39 = vpack.c.bf16 %v258_v37, %v257_v36  ;;  %v242_v41 = vld [vmem:[%s1110_s1 + $0x68] sm:$0xff]  ;;  %v259_v42 = vld [vmem:[%s1110_s1 + $0xf0] sm:$0xff]  ;;  %v260_v43 = vld [vmem:[%s1110_s1 + $0xf8] sm:$0xff] }
   0xf   : > { %s837_s28 = scalar_lea.vmem %s1109_s0, %s593_s15  ;;  %v659_v44 = vpack.c.bf16 %v242_v41, %v241_v40  ;;  %v661_v45 = vpack.c.bf16 %v260_v43, %v259_v42  ;;  %v243_v46 = vld [vmem:[%s1110_s1 + $0x70] sm:$0xff]  ;;  %v244_v47 = vld [vmem:[%s1110_s1 + $0x78] sm:$0xff]  ;;  %v369_v53 = vld [vmem:[%s1112_s3 + $0x8] sm:$0xff]  ;;  %s224_s25 = scalar_lea.vmem %s1114_s5, %s593_s15 }
  0x10   : > { %v226_v25 = vld [vmem:[%s837_s28 + $0x8] sm:$0xff]  ;;  %v663_v48 = vpack.c.bf16 %v244_v47, %v243_v46  ;;  %v225_v49 = vld [vmem:[%s837_s28] sm:$0xff]  ;;  %v228_v50 = vld [vmem:[%s837_s28 + $0x18] sm:$0xff] }
  0x11   : > { %332 = vmatprep.mubr.f32.mxu0 %v226_v25  ;;  %644 = vmatpush3.bf16.msra.mxu0 %v643_v19  ;;  %v227_v51 = vld [vmem:[%s837_s28 + $0x10] sm:$0xff]  ;;  %v371_v54 = vld [vmem:[%s1112_s3 + $0x18] sm:$0xff]  ;;  %v368_v55 = vld [vmem:[%s1112_s3] sm:$0xff] }
  0x12   : > { %646 = vmatprep.subr.bf16.mxu0 %v645_v20  ;;  %v665_v56 = vpack.c.bf16 %v371_v54, %v369_v53  ;;  %v370_v57 = vld [vmem:[%s1112_s3 + $0x10] sm:$0xff]  ;;  %v373_v58 = vld [vmem:[%s1112_s3 + $0x28] sm:$0xff]  ;;  %v375_v59 = vld [vmem:[%s1112_s3 + $0x38] sm:$0xff] }
  0x13   : > { %v667_v60 = vpack.c.bf16 %v370_v57, %v368_v55  ;;  %v669_v61 = vpack.c.bf16 %v375_v59, %v373_v58  ;;  %v372_v62 = vld [vmem:[%s1112_s3 + $0x20] sm:$0xff]  ;;  %v374_v63 = vld [vmem:[%s1112_s3 + $0x30] sm:$0xff]  ;;  %v377_v0 = vld [vmem:[%s1112_s3 + $0x48] sm:$0xff] }
  0x14   : > { %666 = vmatprep.subr.bf16.mxu1 %v665_v56  ;;  %v379_v1 = vld [vmem:[%s1112_s3 + $0x58] sm:$0xff]  ;;  %v671_v2 = vpack.c.bf16 %v374_v63, %v372_v62  ;;  %v376_v4 = vld [vmem:[%s1112_s3 + $0x40] sm:$0xff]  ;;  %v378_v5 = vld [vmem:[%s1112_s3 + $0x50] sm:$0xff] }
  0x15   : > { %648 = vmatpush3.bf16.msra.mxu0 %v647_v26  ;;  %668 = vmatpush1.bf16.msra.mxu1 %v667_v60  ;;  %v673_v3 = vpack.c.bf16 %v379_v1, %v377_v0  ;;  %v381_v6 = vld [vmem:[%s1112_s3 + $0x68] sm:$0xff]  ;;  %v383_v7 = vld [vmem:[%s1112_s3 + $0x78] sm:$0xff]  ;;  %v675_v8 = vpack.c.bf16 %v378_v5, %v376_v4  ;;  %v380_v10 = vld [vmem:[%s1112_s3 + $0x60] sm:$0xff] }
  0x16   : > { %650 = vmatprep.subr.bf16.mxu0 %v649_v27  ;;  %670 = vmatprep.subr.bf16.mxu1 %v669_v61  ;;  %v677_v9 = vpack.c.bf16 %v383_v7, %v381_v6  ;;  %v382_v11 = vld [vmem:[%s1112_s3 + $0x70] sm:$0xff]  ;;  %v385_v12 = vld [vmem:[%s1112_s3 + $0x88] sm:$0xff]  ;;  %v387_v13 = vld [vmem:[%s1112_s3 + $0x98] sm:$0xff] }
  0x17   : > { %v679_v14 = vpack.c.bf16 %v382_v11, %v380_v10  ;;  %v681_v15 = vpack.c.bf16 %v387_v13, %v385_v12  ;;  %v384_v16 = vld [vmem:[%s1112_s3 + $0x80] sm:$0xff]  ;;  %v386_v17 = vld [vmem:[%s1112_s3 + $0x90] sm:$0xff]  ;;  %v389_v18 = vld [vmem:[%s1112_s3 + $0xa8] sm:$0xff] }
  0x18   : > { %v391_v19 = vld [vmem:[%s1112_s3 + $0xb8] sm:$0xff]  ;;  %v683_v20 = vpack.c.bf16 %v386_v17, %v384_v16  ;;  %v388_v22 = vld [vmem:[%s1112_s3 + $0xa0] sm:$0xff]  ;;  %v390_v23 = vld [vmem:[%s1112_s3 + $0xb0] sm:$0xff] }
  0x19   : > { %652 = vmatpush3.bf16.msra.mxu0 %v651_v32  ;;  %672 = vmatpush1.bf16.msra.mxu1 %v671_v2  ;;  %v685_v21 = vpack.c.bf16 %v391_v19, %v389_v18  ;;  %v393_v24 = vld [vmem:[%s1112_s3 + $0xc8] sm:$0xff]  ;;  %v395_v25 = vld [vmem:[%s1112_s3 + $0xd8] sm:$0xff]  ;;  %v687_v26 = vpack.c.bf16 %v390_v23, %v388_v22  ;;  %v392_v28 = vld [vmem:[%s1112_s3 + $0xc0] sm:$0xff] }
  0x1a   : > { %654 = vmatprep.subr.bf16.mxu0 %v653_v33  ;;  %674 = vmatprep.subr.bf16.mxu1 %v673_v3  ;;  %v689_v27 = vpack.c.bf16 %v395_v25, %v393_v24  ;;  %v394_v29 = vld [vmem:[%s1112_s3 + $0xd0] sm:$0xff]  ;;  %v397_v30 = vld [vmem:[%s1112_s3 + $0xe8] sm:$0xff]  ;;  %v399_v31 = vld [vmem:[%s1112_s3 + $0xf8] sm:$0xff] }
  0x1b   : > { %v691_v32 = vpack.c.bf16 %v394_v29, %v392_v28  ;;  %v693_v33 = vpack.c.bf16 %v399_v31, %v397_v30  ;;  %v396_v34 = vld [vmem:[%s1112_s3 + $0xe0] sm:$0xff]  ;;  %v398_v35 = vld [vmem:[%s1112_s3 + $0xf0] sm:$0xff]  ;;  %v401_v36 = vld [vmem:[%s1112_s3 + $0x108] sm:$0xff] }
  0x1c   : > { %v403_v37 = vld [vmem:[%s1112_s3 + $0x118] sm:$0xff]  ;;  %v400_v40 = vld [vmem:[%s1112_s3 + $0x100] sm:$0xff]  ;;  %v402_v41 = vld [vmem:[%s1112_s3 + $0x110] sm:$0xff] }
  0x1d   : > { %656 = vmatpush3.bf16.msra.mxu0 %v655_v38  ;;  %676 = vmatpush1.bf16.msra.mxu1 %v675_v8  ;;  %v695_v38 = vpack.c.bf16 %v398_v35, %v396_v34  ;;  %v405_v42 = vld [vmem:[%s1112_s3 + $0x128] sm:$0xff]  ;;  %v407_v43 = vld [vmem:[%s1112_s3 + $0x138] sm:$0xff]  ;;  %v404_v46 = vld [vmem:[%s1112_s3 + $0x120] sm:$0xff] }
  0x1e   : > { %658 = vmatprep.subr.bf16.mxu0 %v657_v39  ;;  %678 = vmatprep.subr.bf16.mxu1 %v677_v9  ;;  %v697_v39 = vpack.c.bf16 %v403_v37, %v401_v36  ;;  %v406_v47 = vld [vmem:[%s1112_s3 + $0x130] sm:$0xff]  ;;  %v408_v52 = vld [vmem:[%s1112_s3 + $0x140] sm:$0xff]  ;;  %v413_v54 = vld [vmem:[%s1112_s3 + $0x168] sm:$0xff] }
  0x1f   : > { %v410_v53 = vld [vmem:[%s1112_s3 + $0x150] sm:$0xff]  ;;  %v415_v55 = vld [vmem:[%s1112_s3 + $0x178] sm:$0xff]  ;;  %v412_v58 = vld [vmem:[%s1112_s3 + $0x160] sm:$0xff] }
  0x20   : > { %v707_v56 = vpack.c.bf16 %v410_v53, %v408_v52  ;;  %v709_v57 = vpack.c.bf16 %v415_v55, %v413_v54  ;;  %v414_v59 = vld [vmem:[%s1112_s3 + $0x170] sm:$0xff]  ;;  %v417_v60 = vld [vmem:[%s1112_s3 + $0x188] sm:$0xff]  ;;  %v419_v61 = vld [vmem:[%s1112_s3 + $0x198] sm:$0xff] }
  0x21   : > { %660 = vmatpush3.bf16.msra.mxu0 %v659_v44  ;;  %680 = vmatpush1.bf16.msra.mxu1 %v679_v14  ;;  %v699_v44 = vpack.c.bf16 %v402_v41, %v400_v40  ;;  %v711_v62 = vpack.c.bf16 %v414_v59, %v412_v58  ;;  %v713_v63 = vpack.c.bf16 %v419_v61, %v417_v60  ;;  %v416_v0 = vld [vmem:[%s1112_s3 + $0x180] sm:$0xff]  ;;  %v418_v1 = vld [vmem:[%s1112_s3 + $0x190] sm:$0xff]  ;;  %v421_v2 = vld [vmem:[%s1112_s3 + $0x1a8] sm:$0xff]  ;;  %v433_v40 = vlaneseq }
  0x22   : > { %662 = vmatprep.subr.bf16.mxu0 %v661_v45  ;;  %682 = vmatprep.subr.bf16.mxu1 %v681_v15  ;;  %v701_v45 = vpack.c.bf16 %v407_v43, %v405_v42  ;;  %v423_v3 = vld [vmem:[%s1112_s3 + $0x1b8] sm:$0xff]  ;;  %v715_v4 = vpack.c.bf16 %v418_v1, %v416_v0  ;;  %v420_v6 = vld [vmem:[%s1112_s3 + $0x1a0] sm:$0xff]  ;;  %v422_v7 = vld [vmem:[%s1112_s3 + $0x1b0] sm:$0xff] }
  0x23   : > { %v717_v5 = vpack.c.bf16 %v423_v3, %v421_v2  ;;  %v425_v8 = vld [vmem:[%s1112_s3 + $0x1c8] sm:$0xff]  ;;  %v427_v9 = vld [vmem:[%s1112_s3 + $0x1d8] sm:$0xff]  ;;  %v719_v10 = vpack.c.bf16 %v422_v7, %v420_v6  ;;  %v424_v12 = vld [vmem:[%s1112_s3 + $0x1c0] sm:$0xff]  ;;  %v434_v41 = vshrl.u32 %v433_v40, 7 }
  0x24   : > { %v721_v11 = vpack.c.bf16 %v427_v9, %v425_v8  ;;  %v426_v13 = vld [vmem:[%s1112_s3 + $0x1d0] sm:$0xff]  ;;  %v429_v14 = vld [vmem:[%s1112_s3 + $0x1e8] sm:$0xff]  ;;  %v431_v15 = vld [vmem:[%s1112_s3 + $0x1f8] sm:$0xff] }
  0x25   : > { %664 = vmatpush3.bf16.msra.mxu0 %v663_v48  ;;  %684 = vmatpush1.bf16.msra.mxu1 %v683_v20  ;;  %v409_v48 = vld [vmem:[%s1112_s3 + $0x148] sm:$0xff]  ;;  %v723_v16 = vpack.c.bf16 %v426_v13, %v424_v12  ;;  %v725_v17 = vpack.c.bf16 %v431_v15, %v429_v14  ;;  %v428_v18 = vld [vmem:[%s1112_s3 + $0x1e0] sm:$0xff]  ;;  %v430_v19 = vld [vmem:[%s1112_s3 + $0x1f0] sm:$0xff]  ;;  %v435_v42 = vsub.s32 0, %v434_v41 }
  0x26   : > { %686 = vmatprep.subr.bf16.mxu1 %v685_v21  ;;  %v727_v20 = vpack.c.bf16 %v430_v19, %v428_v18  ;;  %v588_v22 = vld [vmem:[%s1111_s2] ss:$0 sm:$0xff] }
  0x27   : > { %v343_v43 = vld [vmem:[%s1113_s4] sm:$0x3] }
  0x28   : > { %333 = vmatmul.mubr.f32.vlgmr.msra.gmra.mrb[0].mxu0 %v225_v49  ;;  %v411_v49 = vld [vmem:[%s1112_s3 + $0x158] sm:$0xff] }
  0x29   : > { %337 = vmatprep.mubr.f32.mxu0 %v228_v50  ;;  %688 = vmatpush1.bf16.msra.mxu1 %v687_v26  ;;  %v703_v50 = vpack.c.bf16 %v406_v47, %v404_v46 }
  0x2a   : > { %690 = vmatprep.subr.bf16.mxu1 %v689_v27 }
  0x2c   : > { %338 = vmatmul.mubr.f32.gmra.mrb[2].mxu0 %v227_v51  ;;  %v705_v51 = vpack.c.bf16 %v411_v49, %v409_v48 }
  0x2d   : > { %692 = vmatpush1.bf16.msra.mxu1 %v691_v32 }
  0x2e   : > { %694 = vmatprep.subr.bf16.mxu1 %v693_v33 }
  0x31   : > { %696 = vmatpush1.bf16.msra.mxu1 %v695_v38 }
  0x32   : > { %698 = vmatprep.subr.bf16.mxu1 %v697_v39 }
  0x35   : > { %700 = vmatpush1.bf16.msra.mxu1 %v699_v44  ;;  %v439_v44 = vsub.s32 1, %v434_v41 }
  0x36   : > { %702 = vmatprep.subr.bf16.mxu1 %v701_v45  ;;  %v436_v45 = vrot.slane %v343_v43, %v435_v42 }
  0x37   : > { %v440_v46 = vrot.slane %v343_v43, %v439_v44 }
  0x39   : > { %704 = vmatpush1.bf16.msra.mxu1 %v703_v50 }
  0x3a   : > { %706 = vmatprep.subr.bf16.mxu1 %v705_v51 }
  0x3d   : > { %708 = vmatpush1.bf16.msra.mxu1 %v707_v56 }
  0x3e   : > { %710 = vmatprep.subr.bf16.mxu1 %v709_v57 }
  0x41   : > { %712 = vmatpush1.bf16.msra.mxu1 %v711_v62 }
  0x42   : > { %714 = vmatprep.subr.bf16.mxu1 %v713_v63 }
  0x45   : > { %716 = vmatpush1.bf16.msra.mxu1 %v715_v4 }
  0x46   : > { %718 = vmatprep.subr.bf16.mxu1 %v717_v5 }
  0x49   : > { %720 = vmatpush1.bf16.msra.mxu1 %v719_v10 }
  0x4a   : > { %722 = vmatprep.subr.bf16.mxu1 %v721_v11 }
  0x4d   : > { %724 = vmatpush1.bf16.msra.mxu1 %v723_v16 }
  0x4e   : > { %726 = vmatprep.subr.bf16.mxu1 %v725_v17 }
  0x51   : > { %728 = vmatpush1.bf16.msra.mxu1 %v727_v20 }
  0xfb   : > { %v627_v21 = vpop.f32.mrb[0].mxu0 }
  0xfc   : > { %v628_v23 = vpop.f32.mrb[1].mxu0 }
  0xfd   : > { %v629_v24 = vadd.f32 %v628_v23, %v627_v21 }
  0xff   : > { %v335_v25 = vadd.f32 %v629_v24, %v588_v22  ;;  %v630_v26 = vpop.f32.mrb[2].mxu0 }
 0x100   : > { %v631_v27 = vpop.f32.mrb[3].mxu0 }
 0x101   : > { %347 = vst.msk [vmem:[#allocation2 + $0x1] sm:$0xff] %vm346_vm1, %v335_v25  ;;  %v632_v28 = vadd.f32 %v631_v27, %v630_v26 }
 0x103   : > { %v340_v29 = vadd.f32 %v632_v28, %v588_v22 }
 0x105   : > { %348 = vst.msk [vmem:[#allocation2 + $0x9] sm:$0xff] %vm346_vm1, %v340_v29 }
 0x108   : > { %v352_v30 = vld [vmem:[#allocation2 + $0x1] sm:$0xff] }
 0x109   : > { %358 = vrot.lane.b32.xlu0 %v352_v30, %s748_s20  ;;  %v350_v34 = vld [vmem:[#allocation2] sm:$0xff] }
 0x10c   : > { %v354_v31 = vld [vmem:[#allocation2 + $0x2] sm:$0xff]  ;;  %v355_v36 = vld [vmem:[#allocation2 + $0xa] sm:$0xff] }
 0x10d   : > { %v353_v32 = vld [vmem:[#allocation2 + $0x9] sm:$0xff]  ;;  %589 = vmatprep.mubr.msk.f32.mxu1 %vm346_vm1, %v354_v31 }
 0x10e   : > { %360 = vrot.lane.b32.xlu0 %v353_v32, %s748_s20  ;;  %v351_v38 = vld [vmem:[#allocation2 + $0x8] sm:$0xff] }
 0x17b   : > { %v359_v33 = vpop.permute.xlu0 %358 }
 0x17c   : > { %v364_v35 = vsel %vm346_vm1, %v350_v34, %v359_v33 }
 0x17d   : > { %508 = vmatmul.mubr.f32.vlgmr.msra.gmra.mrb[0].mxu1 %v364_v35 }
 0x17e   : > { %590 = vmatprep.mubr.msk.f32.mxu1 %vm346_vm1, %v355_v36 }
 0x180   : > { %v361_v37 = vpop.permute.xlu0 %360 }
 0x181   : > { %v365_v39 = vsel %vm346_vm1, %v351_v38, %v361_v37 }
 0x182   : > { %514 = vmatmul.mubr.f32.gmra.mrb[2].mxu1 %v365_v39 }
 0x250   : > { %v509_v47 = vpop.f32.mrb[0].mxu1 }
 0x251   : > { %v510_v48 = vadd.f32 %v509_v47, %v436_v45  ;;  %v511_v49 = vpop.f32.mrb[1].mxu1 }
 0x252   : > { %v512_v50 = vadd.f32 %v511_v49, %v440_v46 }
 0x253   : > { %520 = vst [vmem:[%s224_s25] sm:$0xff] %v510_v48 }
 0x254   : > { %521 = vst [vmem:[%s224_s25 + $0x8] sm:$0xff] %v512_v50 }
 0x255   : > { %v515_v51 = vpop.f32.mrb[2].mxu1 }
 0x256   : > { %v516_v52 = vadd.f32 %v515_v51, %v436_v45  ;;  %v517_v53 = vpop.f32.mrb[3].mxu1 }
 0x257   : > { %v518_v54 = vadd.f32 %v517_v53, %v440_v46 }
 0x258   : > { %522 = vst [vmem:[%s224_s25 + $0x10] sm:$0xff] %v516_v52 }
 0x259   : > { %523 = vst [vmem:[%s224_s25 + $0x18] sm:$0xff] %v518_v54 }
 0x25a PF: > { %s15_s18 = sadd.s32 1, %s745_s18  }
 0x25b   : > { %p12_p4 = scmp.ge.s32.totalorder %s15_s18, 4  }
 0x25d   :  { %14 = sbr.rel (!%p12_p4) target bundleno = 1 (0x1), region = 70 }

</bundles_post_ra>
